<compile_context>
chip_gen: v7x
topology: tpu7x:2x2x1
jax: 0.10.0
libtpu: 0.0.40
codegen_flags: <defaults>
</compile_context>

<pallas_src>
import functools

import numpy as np

import jax
import jax.numpy as jnp
from jax import lax
from jax.experimental import pallas as pl
from jax.experimental.pallas import tpu as pltpu


def _audio_conv1d_kernel(x_ref, h_ref, w_ref, b_ref, o_ref, *,
                         K, TL, pad_l, Bb, L, ragged):
    """One (batch-block, L-tile) step of a 'same'-padded stride-1 Conv1d.

    x_ref : (Bb, Cin, TL)     input tile, L on the lane axis
    h_ref : (Bb, 1, Cin, HW)  halo columns: [0, pad_l) = left, [pad_l, K-1) = right
    w_ref : (K, Cout, Cin)    per-tap weight matrices
    b_ref : (Cout, 1)         bias column (broadcasts over lanes)
    o_ref : (Bb, Cout, TL)
    """
    if ragged:
        # Zero the overhang lanes of the last tile so 'same' padding stays zero.
        t = pl.program_id(1)
        lane = lax.broadcasted_iota(jnp.int32, (1, TL), 1)
        keep = lane < (L - t * TL)            # all-true except on the last tile

    bias = b_ref[...].astype(jnp.float32)     # (Cout, 1)

    for bi in range(Bb):
        x = x_ref[bi]                          # (Cin, TL)
        if ragged:
            x = jnp.where(keep, x, jnp.zeros_like(x))
        if K > 1:
            h = h_ref[bi, 0]                   # (Cin, K-1)

        acc = None
        for k in range(K):
            s = k - pad_l                      # tap shift: xk[l] = x_global[l + s]
            if s == 0:
                xk = x
            elif s < 0:
                # shifted right: first |s| lanes come from the left halo
                xk = jnp.concatenate([h[:, pad_l + s:pad_l], x[:, :TL + s]], axis=1)
            else:
                # shifted left: last s lanes come from the right halo
                xk = jnp.concatenate([x[:, s:], h[:, pad_l:pad_l + s]], axis=1)
            part = jnp.dot(w_ref[k], xk, preferred_element_type=jnp.float32)
            acc = part if acc is None else acc + part

        o_ref[bi] = (acc + bias).astype(o_ref.dtype)


def audio_conv1d(x_ncl, weight, bias, *, tile_l_cap=8192,
                 vmem_budget_bytes=12 * 1024 * 1024):
    """nn.Conv1d(Cin, Cout, K, stride=1, padding='same', dilation=1) forward.

    x_ncl:  (B, Cin, L)   PyTorch NCL layout, kept end-to-end (no transposes)
    weight: (Cout, Cin, K)
    bias:   (Cout,)
    returns (B, Cout, L)
    """
    B, Cin, L = x_ncl.shape
    Cout, Cin_w, K = weight.shape
    assert Cin_w == Cin
    pad_l = (K - 1) // 2
    pad_r = K - 1 - pad_l
    dt = x_ncl.dtype
    itemsize = jnp.dtype(dt).itemsize

    LANE, SUB = 128, 8
    cin_p = -(-Cin // SUB) * SUB
    cout_p = -(-Cout // SUB) * SUB

    # --- L tiling: biggest lane-aligned tile within the double-buffered VMEM
    #     budget, capped at tile_l_cap (keeps v7x's 64 MiB VMEM safe too).
    per_lane_bytes = 2 * (cin_p + cout_p) * itemsize          # in + out, x2 buffers
    tl_vmem = max(LANE, (vmem_budget_bytes // per_lane_bytes) // LANE * LANE)
    tl_cap = max(LANE, min(tile_l_cap, tl_vmem))
    if L <= tl_cap:
        TL, nT = L, 1                                         # single full tile
    else:
        TL = tl_cap
        nT = -(-L // TL)
    ragged = (L % TL) != 0

    # --- batch blocking: fatten per-step DMAs, but keep >=2 grid steps when
    #     possible so both v7x TensorCores get work on the short-L path.
    per_batch_bytes = per_lane_bytes * TL
    Bb = 1
    for cand in range(min(B, 8), 0, -1):
        if B % cand or cand * per_batch_bytes > vmem_budget_bytes:
            continue
        if (B // cand) * nT >= 2 or cand == 1:
            Bb = cand
            break
    nB = B // Bb

    # --- per-tile halo columns (B, nT, Cin, K-1): one tiny gather (a few columns
    #     per tile boundary) instead of a full-array HBM pad / two tiny DMAs.
    #     Last-axis layout: [left pad_l | right pad_r]; invalid positions -> 0.
    HW = max(K - 1, 1)
    if K > 1:
        offs = np.concatenate([np.arange(-pad_l, 0), np.arange(TL, TL + pad_r)])
        pos = np.arange(nT)[:, None] * TL + offs[None, :]      # (nT, K-1)
        ok = (pos >= 0) & (pos < L)
    else:
        pos = np.zeros((nT, HW), dtype=np.int64)
        ok = np.zeros((nT, HW), dtype=bool)
    idx = jnp.asarray(np.clip(pos, 0, L - 1).reshape(-1), dtype=jnp.int32)
    halo = jnp.take(x_ncl, idx, axis=2).reshape(B, Cin, nT, HW)
    halo = halo * jnp.asarray(ok, dtype=dt)[None, None]
    halo = jnp.transpose(halo, (0, 2, 1, 3))                   # (B, nT, Cin, HW)

    # --- per-tap weight matrices and bias column (tiny, resident in VMEM).
    w_taps = jnp.transpose(weight, (2, 0, 1)).astype(dt)       # (K, Cout, Cin)
    b_col = bias.reshape(Cout, 1)

    kernel = functools.partial(_audio_conv1d_kernel, K=K, TL=TL, pad_l=pad_l,
                               Bb=Bb, L=L, ragged=ragged)

    return pl.pallas_call(
        kernel,
        out_shape=jax.ShapeDtypeStruct((B, Cout, L), dt),
        grid_spec=pltpu.PrefetchScalarGridSpec(
            num_scalar_prefetch=0,
            grid=(nB, nT),
            in_specs=[
                pl.BlockSpec((Bb, Cin, TL), lambda b, t: (b, 0, t)),
                pl.BlockSpec((Bb, 1, Cin, HW), lambda b, t: (b, t, 0, 0)),
                pl.BlockSpec((K, Cout, Cin), lambda b, t: (0, 0, 0)),
                pl.BlockSpec((Cout, 1), lambda b, t: (0, 0)),
            ],
            out_specs=pl.BlockSpec((Bb, Cout, TL), lambda b, t: (b, 0, t)),
        ),
        compiler_params=pltpu.CompilerParams(
            dimension_semantics=("parallel", "parallel"),
            vmem_limit_bytes=32 * 1024 * 1024,
        ),
        cost_estimate=pl.CostEstimate(
            flops=2 * B * L * Cout * Cin * K,
            transcendentals=0,
            bytes_accessed=(B * Cin * L + B * Cout * L
                            + w_taps.size + b_col.size + halo.size) * itemsize,
        ),
    )(x_ncl, halo, w_taps, b_col)


if __name__ == "__main__":
    key = jax.random.PRNGKey(0)

    def check(B, Cin, Cout, L, K, tile_l_cap=8192, tol=1e-4):
        kx, kw, kb = jax.random.split(jax.random.fold_in(key, 1000 * L + K), 3)
        x = jax.random.normal(kx, (B, Cin, L), dtype=jnp.float32)
        weight = jax.random.normal(kw, (Cout, Cin, K), dtype=jnp.float32) * 0.1
        bias = jax.random.normal(kb, (Cout,), dtype=jnp.float32) * 0.1

        out = jax.block_until_ready(
            audio_conv1d(x, weight, bias, tile_l_cap=tile_l_cap))

        ref = jax.lax.conv_general_dilated(
            x, weight, window_strides=(1,), padding="SAME",
            dimension_numbers=("NCH", "OIH", "NCH"),
            precision=jax.lax.Precision.HIGHEST,
        ) + bias[None, :, None]
        assert out.shape == (B, Cout, L), out.shape
        err = jnp.max(jnp.abs(out - ref))
        assert err < tol, err

    # Typical small use of the module (single L tile, batch axis feeds the grid).
    check(B=2, Cin=4, Cout=8, L=16, K=3)
    # Multi-tile path: halos across tile boundaries, ragged tail, batch blocking.
    check(B=2, Cin=4, Cout=8, L=200, K=3, tile_l_cap=128)
    # Wider kernel (multi-column halos on both sides of each tile).
    check(B=2, Cin=4, Cout=8, L=200, K=5, tile_l_cap=128)
    # Default big-tile path (TL=8192) with a ragged last tile.
    check(B=2, Cin=4, Cout=8, L=20000, K=3)

    print("KERNEL_OK")
</pallas_src>

<mosaic_0001>
module attributes {stable_mosaic.version = 11 : i64} {
  func.func @_audio_conv1d_kernel(%arg0: i32, %arg1: i32, %arg2: memref<1x4x16xf32, #tpu.memory_space<vmem>>, %arg3: memref<1x1x4x2xf32, #tpu.memory_space<vmem>>, %arg4: memref<3x8x4xf32, #tpu.memory_space<vmem>>, %arg5: memref<8x1xf32, #tpu.memory_space<vmem>>, %arg6: memref<1x8x16xf32, #tpu.memory_space<vmem>>) attributes {dimension_semantics = [#tpu.dimension_semantics<parallel>, #tpu.dimension_semantics<parallel>], iteration_bounds = array<i64: 2, 1>, scalar_prefetch = 0 : i64, scratch_operands = 0 : i64, tpu.core_type = #tpu.core_type<tc>, window_params = [{transform_indices = @transform_0, window_bounds = array<i64: 1, 4, 16>}, {transform_indices = @transform_1, window_bounds = array<i64: 1, 1, 4, 2>}, {pipeline_mode = #tpu.pipeline_mode<synchronous>, transform_indices = @transform_2, window_bounds = array<i64: 3, 8, 4>}, {pipeline_mode = #tpu.pipeline_mode<synchronous>, transform_indices = @transform_3, window_bounds = array<i64: 8, 1>}, {transform_indices = @transform_4, window_bounds = array<i64: 1, 8, 16>}]} {
    %c0 = arith.constant 0 : index
    %c0_0 = arith.constant 0 : index
    %0 = vector.load %arg5[%c0, %c0_0] : memref<8x1xf32, #tpu.memory_space<vmem>>, vector<8x1xf32>
    %c0_1 = arith.constant 0 : index
    %c0_2 = arith.constant 0 : index
    %c0_3 = arith.constant 0 : index
    %1 = vector.load %arg2[%c0_1, %c0_2, %c0_3] : memref<1x4x16xf32, #tpu.memory_space<vmem>>, vector<1x4x16xf32>
    %2 = vector.shape_cast %1 : vector<1x4x16xf32> to vector<4x16xf32>
    %c0_4 = arith.constant 0 : index
    %c0_5 = arith.constant 0 : index
    %c0_6 = arith.constant 0 : index
    %c0_7 = arith.constant 0 : index
    %3 = vector.load %arg3[%c0_4, %c0_5, %c0_6, %c0_7] : memref<1x1x4x2xf32, #tpu.memory_space<vmem>>, vector<1x1x4x2xf32>
    %4 = vector.shape_cast %3 : vector<1x1x4x2xf32> to vector<4x2xf32>
    %5 = vector.extract_strided_slice %4 {offsets = [0, 0], sizes = [4, 1], strides = [1, 1]} : vector<4x2xf32> to vector<4x1xf32>
    %6 = vector.extract_strided_slice %2 {offsets = [0, 0], sizes = [4, 15], strides = [1, 1]} : vector<4x16xf32> to vector<4x15xf32>
    %7 = tpu.concatenate %5, %6 in 1 : vector<4x1xf32>, vector<4x15xf32> -> vector<4x16xf32>
    %c0_8 = arith.constant 0 : index
    %c0_9 = arith.constant 0 : index
    %c0_10 = arith.constant 0 : index
    %8 = vector.load %arg4[%c0_8, %c0_9, %c0_10] : memref<3x8x4xf32, #tpu.memory_space<vmem>>, vector<1x8x4xf32>
    %9 = vector.shape_cast %8 : vector<1x8x4xf32> to vector<8x4xf32>
    %cst = arith.constant dense<0.000000e+00> : vector<8x16xf32>
    %10 = tpu.matmul %9, %7, %cst {dimension_numbers = #tpu.dot_dimension_numbers<[1], [0], [0], [1], [0, 0, 1, 1], [], []>} : vector<8x4xf32>, vector<4x16xf32>, vector<8x16xf32> -> vector<8x16xf32>
    %c1 = arith.constant 1 : index
    %c0_11 = arith.constant 0 : index
    %c0_12 = arith.constant 0 : index
    %11 = vector.load %arg4[%c1, %c0_11, %c0_12] : memref<3x8x4xf32, #tpu.memory_space<vmem>>, vector<1x8x4xf32>
    %12 = vector.shape_cast %11 : vector<1x8x4xf32> to vector<8x4xf32>
    %cst_13 = arith.constant dense<0.000000e+00> : vector<8x16xf32>
    %13 = tpu.matmul %12, %2, %cst_13 {dimension_numbers = #tpu.dot_dimension_numbers<[1], [0], [0], [1], [0, 0, 1, 1], [], []>} : vector<8x4xf32>, vector<4x16xf32>, vector<8x16xf32> -> vector<8x16xf32>
    %14 = arith.addf %10, %13 : vector<8x16xf32>
    %15 = vector.extract_strided_slice %2 {offsets = [0, 1], sizes = [4, 15], strides = [1, 1]} : vector<4x16xf32> to vector<4x15xf32>
    %16 = vector.extract_strided_slice %4 {offsets = [0, 1], sizes = [4, 1], strides = [1, 1]} : vector<4x2xf32> to vector<4x1xf32>
    %17 = tpu.concatenate %15, %16 in 1 : vector<4x15xf32>, vector<4x1xf32> -> vector<4x16xf32>
    %c2 = arith.constant 2 : index
    %c0_14 = arith.constant 0 : index
    %c0_15 = arith.constant 0 : index
    %18 = vector.load %arg4[%c2, %c0_14, %c0_15] : memref<3x8x4xf32, #tpu.memory_space<vmem>>, vector<1x8x4xf32>
    %19 = vector.shape_cast %18 : vector<1x8x4xf32> to vector<8x4xf32>
    %cst_16 = arith.constant dense<0.000000e+00> : vector<8x16xf32>
    %20 = tpu.matmul %19, %17, %cst_16 {dimension_numbers = #tpu.dot_dimension_numbers<[1], [0], [0], [1], [0, 0, 1, 1], [], []>} : vector<8x4xf32>, vector<4x16xf32>, vector<8x16xf32> -> vector<8x16xf32>
    %21 = arith.addf %14, %20 : vector<8x16xf32>
    %22 = vector.broadcast %0 : vector<8x1xf32> to vector<8x16xf32>
    %23 = arith.addf %21, %22 : vector<8x16xf32>
    %c0_17 = arith.constant 0 : index
    %c0_18 = arith.constant 0 : index
    %c0_19 = arith.constant 0 : index
    %24 = vector.load %arg6[%c0_17, %c0_18, %c0_19] : memref<1x8x16xf32, #tpu.memory_space<vmem>>, vector<1x8x16xf32>
    %25 = vector.shape_cast %24 : vector<1x8x16xf32> to vector<8x16xf32>
    %26 = vector.shape_cast %23 : vector<8x16xf32> to vector<1x8x16xf32>
    tpu.vector_store %arg6[%c0_17, %c0_18, %c0_19], %26 {strides = array<i32>} : memref<1x8x16xf32, #tpu.memory_space<vmem>>, vector<1x8x16xf32>,
    return
  }
  func.func @transform_0(%arg0: i32, %arg1: i32) -> (i32, i32, i32) {
    %c0_i32 = arith.constant 0 : i32
    %c0_i32_0 = arith.constant 0 : i32
    return %arg0, %c0_i32, %arg1 : i32, i32, i32
  }
  func.func @transform_1(%arg0: i32, %arg1: i32) -> (i32, i32, i32, i32) {
    %c0_i32 = arith.constant 0 : i32
    %c0_i32_0 = arith.constant 0 : i32
    %c0_i32_1 = arith.constant 0 : i32
    return %arg0, %arg1, %c0_i32, %c0_i32_0 : i32, i32, i32, i32
  }
  func.func @transform_2(%arg0: i32, %arg1: i32) -> (i32, i32, i32) {
    %c0_i32 = arith.constant 0 : i32
    %c0_i32_0 = arith.constant 0 : i32
    %c0_i32_1 = arith.constant 0 : i32
    %c0_i32_2 = arith.constant 0 : i32
    return %c0_i32, %c0_i32_0, %c0_i32_1 : i32, i32, i32
  }
  func.func @transform_3(%arg0: i32, %arg1: i32) -> (i32, i32) {
    %c0_i32 = arith.constant 0 : i32
    %c0_i32_0 = arith.constant 0 : i32
    %c0_i32_1 = arith.constant 0 : i32
    return %c0_i32, %c0_i32_0 : i32, i32
  }
  func.func @transform_4(%arg0: i32, %arg1: i32) -> (i32, i32, i32) {
    %c0_i32 = arith.constant 0 : i32
    %c0_i32_0 = arith.constant 0 : i32
    return %arg0, %c0_i32, %arg1 : i32, i32, i32
  }
}

</mosaic_0001>

<bundles_post_ra>
// kernel: tpu_custom_call.1
= control target key start
LH: loop header
LB: loop body
LE: loop exit
PB: predicated region body
PF: predicated region fallthrough
CT: control target
= control target key end

     0   :  { %9 = vsyncpa [#allocation3], 0  ;;  %s960_s0 = inlined_call_operand.vmem [shape: f32[2,4,16], index: 0, kind: input, shape index: {}]   ;;  %s961_s1 = inlined_call_operand.vmem [shape: f32[2,1,4,2], index: 1, kind: input, shape index: {}]   ;;  %s962_s2 = inlined_call_operand.vmem [shape: f32[3,8,4], index: 2, kind: input, shape index: {}]   ;;  %s963_s3 = inlined_call_operand.vmem [shape: f32[8,1], index: 3, kind: input, shape index: {}]   ;;  %s964_s4 = inlined_call_operand.hbm [shape: f32[2,8,16], index: 4, kind: output, shape index: {}]  }
   0x1   :  { %11 = vsyncpa [#allocation3 + $0x1], 0  ;;  %s824_s15 = smov 0   ;;  %s826_s16 = smov 0  }
   0x2   :  { %s828_s17 = smov 0   ;;  %s830_s18 = smov 0  }
   0x3   :  { %s832_s19 = smov 0   ;;  %s834_s20 = smov 0  }
   0x4 LB: > { %s608_s21 = sadd.s32 4294967295, %s790_s20   ;;  %s609_s22 = sadd.s32 4294967294, %s790_s20   ;;  %s790_s20 = sphi %s834_s20, %s17_s20   ;;  %s786_s19 = sphi %s832_s19, %s971_s19   ;;  %s782_s18 = sphi %s830_s18, %s970_s18   ;;  %s778_s17 = sphi %s828_s17, %s969_s17   ;;  %s774_s16 = sphi %s826_s16, %s968_s16   ;;  %s770_s15 = sphi %s824_s15, %s967_s15  }
   0x5   : > { %s29_s23 = sadd.s32 1, %s786_s19  ;;  %s136_s24 = sadd.s32 1, %s778_s17 }
   0x6   : > { %p31_p0 = scmp.ge.s32.totalorder %s29_s23, 2  ;;  %p146_p1 = scmp.ne.s32.totalorder %s778_s17, %s774_s16 }
   0x7   : > { %p147_p2 = scmp.eq.s32.totalorder %s608_s21, 1  ;;  %p152_p3 = scmp.ne.s32.totalorder %s774_s16, %s770_s15 }
   0x8   : > { %s973_s23 = smov (%p31_p0, %s29_s23), 0  ;;  %p153_p5 = scmp.eq.s32.totalorder %s609_s22, 1 }
   0x9   : > { %p864_p4 = por %p147_p2, %p146_p1  ;;  %s131_s26 = ssub.s32 %s786_s19, %s973_s23 }
   0xa   : > { %p612_p6 = scmp.ge.s32.totalorder %s790_s20, 1  ;;  %p134_p7 = scmp.eq.s32.totalorder %s131_s26, 0 }
   0xb   : > { %p871_p8 = por %p153_p5, %p152_p3  ;;  %p197_p9 = scmp.lt.s32.totalorder %s790_s20, 3 }
   0xc   : > { %s877_s28 = scalar_select %p134_p7, %s778_s17, %s136_s24  }
   0xd   : > { %p198_p10 = pnand %p612_p6, %p197_p9 }
   0xe   : > { %p232_p11 = scmp.lt.s32.totalorder (!%p198_p10), %s782_s18, 1  ;;  %v792_v0 = vmov (!%p198_p10), 0.0   ;;  %vm793_vm0 = vmmov (!%p198_p10), 0   ;;  %v794_v1 = vmov (!%p198_p10), 0   ;;  %vm262_vm1 = vcmask (!%p198_p10), 1043456   ;;  %v616_v4 = vld [vmem:[%s962_s2 + $0x8] sm:$0xff] (!%p198_p10) }
   0xf   : > { %201 = sbr.rel (%p198_p10) target bundleno = 378 (0x17a), region = 36  ;;  %639 = vmatprep.subr.mxu1 (!%p198_p10), %v792_v0  ;;  %634 = vmatprep.subr.mxu0 (!%p198_p10), %v792_v0  ;;  %vm258_vm2 = vcmask (!%p198_p10), 31744   ;;  %s795_s13 = smov (!%p198_p10), 1   ;;  %v246_v5 = vld [vmem:[%s963_s3] sm:$0xff] (!%p198_p10)  ;;  %vm253_vm3 = vcmask (!%p198_p10), 7168   ;;  %vm418_vm4 = vcmask (!%p198_p10), 121856  }
  0x10   : > { %636 = vmatprep.mubr.msk.f32.mxu0 (!%p198_p10), %vm793_vm0, %v792_v0  ;;  %641 = vmatprep.mubr.msk.f32.mxu1 (!%p198_p10), %vm793_vm0, %v792_v0  ;;  %s796_s14 = smov (!%p198_p10), 14   ;;  %s797_s24 = smov (!%p198_p10), 127   ;;  %v255_v7 = vld [vmem:[%s962_s2] sm:$0xff] (!%p198_p10)  ;;  %v621_v11 = vld [vmem:[%s962_s2 + $0x10] sm:$0xff] (!%p198_p10)  ;;  %vm505_vm5 = vcmask (!%p198_p10), 130048  }
  0x11   : > { %710 = vset.pattern.permute.xlu1 (!%p198_p10), %v794_v1  ;;  %711 = vset.pattern.permute.xlu0 (!%p198_p10), %v794_v1  ;;  %s229_s6 = sand.u32 (!%p198_p10), 1, %s774_s16   ;;  %s625_s8 = sshll.u32 (!%p198_p10), %s782_s18, 7 }
  0x16   : > { %s233_s29 = scalar_select %p232_p11, %s782_s18, 1 }
  0x17   : > { %s798_s18 = smov [#allocation2]  }
  0x18   : > { %s614_s30 = sshll.u32 %s233_s29, 2  ;;  %s716_s22 = sshll.u32 %s798_s18, 4  ;;  %s717_s22 = int_to_ptr.vmem [resolvable:$false] %s716_s22 }
  0x19   : > { %s238_s7 = scalar_lea.vmem %s960_s0, %s614_s30  ;;  %s245_s10 = scalar_lea.vmem %s961_s1, %s614_s30 }
  0x1a   : > { %v247_v2 = vld [vmem:[%s238_s7] sm:$0xf]  ;;  %s613_s7 = sshll.u32 %s229_s6, 3 }
  0x1b   : > { %v248_v3 = vld [vmem:[%s245_s10] sm:$0xf]  ;;  %250 = vrot.lane.b32.xlu0 %v247_v2, %s795_s13  ;;  %635 = vmatpush3.msk.msra.mxu0 %vm262_vm1, %v247_v2  ;;  %s231_s9 = scalar_lea.vmem [#allocation2], %s613_s7  ;;  %s913_s13 = scalar_lea.hbm %s964_s4, %s625_s8 }
  0x1c   : > { %415 = vrot.lane.b32.xlu1 %v248_v3, %s796_s14  ;;  %637 = vmatmul.mubr.msk.f32.vlgmr.msra.gmra.mrb[0].mxu0 %vm258_vm2, %v616_v4  ;;  %s522_s10 = sshll.u32 %s231_s9, 4  ;;  %s508_s14 = scalar_lea.sflag [#allocation3], %s229_s6  ;;  %s915_s10 = int_to_ptr.vmem [resolvable:$true] %s522_s10 }
  0x1d   : > { %644 = vmatprep.subr.mxu0 %v792_v0  ;;  %646 = vmatprep.mubr.msk.f32.mxu0 %vm793_vm0, %v792_v0  ;;  %s712_s21 = scalar_lea.vmem %s915_s10, 128  ;;  %p719_p1 = scmp.lt.s32.totalorder %s915_s10, %s717_s22 }
  0x1e   : > { %p713_p12 = scmp.ne.s32.totalorder %s915_s10, %s712_s21 }
  0x1f   : > { %411 = vrot.lane.b32.xlu0 %v247_v2, %s797_s24  ;;  %s718_s24 = scalar_lea.vmem %s717_s22, 256 }
  0x20   : > { %501 = vperm.xlu1 %710, %v246_v5   ;;  %p714_p13 = pnand %p713_p12, %p864_p4  ;;  %p720_p2 = scmp.lt.s32.totalorder %s718_s24, %s712_s21 }
  0x22   : > { %p715_p0 = pneg %p714_p13  ;;  %p721_p3 = por %p720_p2, %p719_p1 }
  0x24   : > { %p722_p5 = pnand %p721_p3, %p715_p0 }
  0x8d   : > { %v251_v6 = vpop.permute.xlu0 %250 }
  0x8e   : > { %v254_v8 = vsel %vm253_vm3, %v248_v3, %v251_v6  ;;  %v416_v9 = vpop.permute.xlu1 %415 }
  0x8f   : > { %640 = vmatpush3.msk.msra.mxu1 %vm262_vm1, %v254_v8 }
  0x90   : > { %642 = vmatmul.mubr.msk.f32.vlgmr.msra.gmra.mrb[0].mxu1 %vm258_vm2, %v255_v7 }
  0x91   : > { %v412_v10 = vpop.permute.xlu0 %411 }
  0x92   : > { %v419_v12 = vsel %vm418_vm4, %v412_v10, %v416_v9 }
  0x93   : > { %645 = vmatpush3.msk.msra.mxu0 %vm262_vm1, %v419_v12 }
  0x94   : > { %647 = vmatmul.mubr.msk.f32.vlgmr.msra.gmra.mrb[2].mxu0 %vm258_vm2, %v621_v11 }
  0x9f   : > { %v502_v19 = vpop.permute.xlu1 %501 }
  0xef   : > { %v331_v13 = vpop.f32.mrb[0].mxu0 }
  0xf0   : > { %v638_v14 = vpop.f32.mrb[1].mxu0 }
 0x163   : > { %v407_v15 = vpop.f32.mrb[0].mxu1 }
 0x164   : > { %v408_v16 = vadd.f32 %v407_v15, %v331_v13  ;;  %v643_v17 = vpop.f32.mrb[1].mxu1 }
 0x167   : > { %v494_v18 = vpop.f32.mrb[2].mxu0 }
 0x168   : > { %v498_v20 = vadd.f32 %v494_v18, %v408_v16  ;;  %v648_v21 = vpop.f32.mrb[3].mxu0 }
 0x16a   : > { %v504_v22 = vadd.f32 %v502_v19, %v498_v20 }
 0x16c   : > { %506 = vst.msk [vmem:[%s231_s9] sm:$0xff] %vm505_vm5, %v504_v22 }
 0x16d   : > { %725 = shalt.err (!%p722_p5)
}
 0x16e   : > { %s726_s26 = scalar_lea.hbm %s913_s13, 128  ;;  %s730_s5 = scalar_lea.hbm %s964_s4, 256 }
 0x16f   : > { %p727_p6 = scmp.ne.s32.totalorder %s913_s13, %s726_s26  ;;  %p731_p10 = scmp.lt.u32.totalorder %s913_s13, %s964_s4 }
 0x170   : > { %p732_p11 = scmp.lt.u32.totalorder %s730_s5, %s726_s26  ;;  %p734_p13 = scmp.lt.u32.totalorder %s726_s26, %s913_s13 }
 0x171   : > { %p728_p7 = pnand %p727_p6, %p864_p4 }
 0x172   : > { %p733_p12 = por %p732_p11, %p731_p10 }
 0x173   : > { %p729_p9 = pneg %p728_p7 }
 0x174   : > { %p735_p0 = por %p734_p13, %p733_p12 }
 0x176   : > { %p736_p1 = pnand %p735_p0, %p729_p9 }
 0x178   : > { %739 = shalt.err (!%p736_p1)
}
 0x179   : > { %649 = dma.vmem_to_hbm [thread:$0]  (%p864_p4), %s915_s10, 128, %s913_s13, %s508_s14  }
 0x17a PF: > { %p655_p2 = scmp.ge.s32.totalorder %s790_s20, 2  ;;  %s534_s8 = sand.u32 1, %s770_s15  }
 0x17b   : > { %s535_s9 = scalar_lea.sflag [#allocation3], %s534_s8 }
 0x17c   : > { %p652_p3 = pnand %p655_p2, %p871_p8 }
 0x17e   : > { %765 = dma.done.wait (!%p652_p3), %s535_s9, 128  }
 0x17f   : > { %767 = vsyncadd (!%p652_p3), %s535_s9, 4294967168  ;;  %s17_s20 = sadd.s32 1, %s790_s20   ;;  %s967_s15 = smov %s774_s16 }
 0x180   : > { %p14_p5 = scmp.ge.s32.totalorder %s17_s20, 4   ;;  %s968_s16 = smov %s778_s17 }
 0x181   : > { %s969_s17 = smov %s877_s28  ;;  %s970_s18 = smov %s786_s19 }
 0x182   : > { %s971_s19 = smov %s973_s23  ;;  %16 = sbr.rel (!%p14_p5) target bundleno = 4 (0x4), region = 76 }
 0x189   :  { %540 = vsyncpa [#allocation3], 1 }
 0x18a   :  { %542 = vsyncpa [#allocation3 + $0x1], 1 }

</bundles_post_ra>
